<compile_context>
chip_gen: v6e
topology: v6e:2x2x1
jax: 0.10.0
libtpu: 0.0.40
codegen_flags: <defaults>
</compile_context>

<pallas_src>
import jax
import jax.numpy as jnp
from jax import lax
from jax.experimental import pallas as pl
from jax.experimental.pallas import tpu as pltpu


# ----------------------------- Pallas kernel ---------------------------------
def _haar4(a, b, c, d):
    """4-point +-1 Haar butterfly over corners (0,0),(0,1),(1,0),(1,1)."""
    s0 = a + b
    s1 = a - b
    s2 = c + d
    s3 = c - d
    return (s0 + s2,   # band 0 : + + + +
            s1 + s3,   # band 1 : + - + -
            s0 - s2,   # band 2 : + + - -
            s1 - s3)   # band 3 : + - - +


def _make_haar2_kernel(tr, rc):
    """Fused (HaarDS o HaarDS) on [16, tr, L] corner-plane tiles.

    Input plane r_in = 4*u + v holds x[.., 4p+u, 4q+v] (spatial flattened and
    lane-dense on the last dim).  Output plane r_out = 4*g + f is outer band g,
    inner band f.  The butterfly is chunked over `rc`-row slabs inside a
    fori_loop so live ranges stay bounded (#3 in the review).
    """
    n_chunks = tr // rc

    def compute_chunk(x_ref, o_ref, rows):
        p = [x_ref[r, rows, :].astype(jnp.float32) for r in range(16)]

        # level 1: first HaarDS over (di, dj) inside each 2x2 corner group
        t = {}
        for ei in (0, 1):
            for ej in (0, 1):
                base = 8 * ei + 2 * ej
                t[(ei, ej)] = _haar4(p[base + 0], p[base + 1],
                                     p[base + 4], p[base + 5])

        # level 2: second HaarDS over (ei, ej), + the composed 1/16 scale
        for f in range(4):
            z = _haar4(t[(0, 0)][f], t[(0, 1)][f],
                       t[(1, 0)][f], t[(1, 1)][f])
            for g in range(4):
                o_ref[4 * g + f, rows, :] = (z[g] * 0.0625).astype(o_ref.dtype)

    def kernel(x_ref, o_ref):
        if n_chunks == 1:
            compute_chunk(x_ref, o_ref, pl.ds(0, tr))
        else:
            def body(j, carry):
                rows = pl.ds(pl.multiple_of(j * rc, rc), rc)
                compute_chunk(x_ref, o_ref, rows)
                return carry
            lax.fori_loop(0, n_chunks, body, 0)

    return kernel


# ----------------------------- tile selection ---------------------------------
_TARGET_BLOCK_BYTES = 4 * 1024 * 1024   # per input block; x4 when in+out are
                                        # double-buffered -> fits v7x's VMEM and
                                        # sits at the roofline plateau on v5e/v6e


def _largest_divisor_leq(n, cap):
    for d in range(min(n, cap), 0, -1):
        if n % d == 0:
            return d
    return 1


def _pick_tiles(s, itemsize, batch_steps):
    """Pick (L, TR, R): lane width and rows-per-block of the [16, R, L] view."""
    # Lane width: multiple of 128 whenever the flattened spatial size allows it
    # (dense, unmasked stores + contiguous DMAs); otherwise a full-ish divisor.
    if s % 128 == 0:
        lane = 128
    else:
        lane = _largest_divisor_leq(s, 2048)
    rows_total = s // lane

    # Rows per block: largest *legal* divisor under the byte budget.  Legal
    # sublane block sizes are multiples of 8 or the full extent.
    cap = max(1, _TARGET_BLOCK_BYTES // (16 * lane * itemsize))
    cand = [d for d in range(8, min(rows_total, cap) + 1, 8)
            if rows_total % d == 0]
    if cand:
        tr = cand[-1]
    else:
        tr = rows_total   # full extent is always a legal block shape
        # TODO(synk): huge spatial sizes whose R has no multiple-of-8 divisor
        # fall back to one full-height block; masked partial tiles would fix it.

    # v7x megacore balance: make sure the grid has >= 2 steps to feed both TCs.
    if batch_steps * (rows_total // tr) < 2:
        smaller = [d for d in cand if d <= rows_total // 2]
        if smaller:
            tr = smaller[-1]

    return lane, tr, rows_total


# ----------------------------- forward wrapper --------------------------------
def rescale_forward(x):
    """Rescale.forward(x, rev=False, c=False) for the default (2x HaarDS) config."""
    B, C, H, W = x.shape
    if H % 4 or W % 4:
        raise ValueError("H and W must be multiples of 4 for down_num=2")
    H4, W4 = H // 4, W // 4
    S = H4 * W4

    itemsize = x.dtype.itemsize
    L, TR, R = _pick_tiles(S, itemsize, B * C)
    if TR % 8 == 0:
        rc = 8
    elif TR <= 8:
        rc = TR
    elif TR % 4 == 0:
        rc = 4
    elif TR % 2 == 0:
        rc = 2
    else:
        rc = 1

    # Corner-plane, lane-dense layout: ONE XLA transpose (reshapes are free).
    # xg[b, c, 4*u + v, s // L, s % L] = x[b, c, 4*p + u, 4*q + v],  s = p*W4 + q
    xg = (x.reshape(B, C, H4, 4, W4, 4)
           .transpose(0, 1, 3, 5, 2, 4)
           .reshape(B, C, 16, R, L))

    grid = (B, C, R // TR)
    block_bytes = 16 * TR * L * itemsize
    vmem_limit = int(min(64 * 2**20, max(32 * 2**20, 6 * block_bytes)))

    out5 = pl.pallas_call(
        _make_haar2_kernel(TR, rc),
        out_shape=jax.ShapeDtypeStruct((B, 16, C, R, L), x.dtype),
        grid=grid,
        in_specs=[
            pl.BlockSpec((None, None, 16, TR, L),
                         lambda b, c, s: (b, c, 0, s, 0)),
        ],
        out_specs=pl.BlockSpec((None, 16, None, TR, L),
                               lambda b, c, s: (b, 0, c, s, 0)),
        compiler_params=pltpu.CompilerParams(
            dimension_semantics=("parallel", "parallel", "parallel"),
            vmem_limit_bytes=vmem_limit),
    )(xg)

    # [B, 16, C, R, L] -> [B, 16*C, H4, W4]; channel = (4*g + f) * C + c,
    # exactly HaarDS(HaarDS(x)) ordering.  Pure reshape (no transpose) = free.
    return out5.reshape(B, 16 * C, H4, W4)


# ---------------- pure-JAX reference (mirrors the PyTorch grouped conv) -------
def _haar_ds_ref(x):
    B, C, H, W = x.shape
    base = jnp.array(
        [[[1.0, 1.0], [1.0, 1.0]],
         [[1.0, -1.0], [1.0, -1.0]],
         [[1.0, 1.0], [-1.0, -1.0]],
         [[1.0, -1.0], [-1.0, 1.0]]],
        dtype=x.dtype,
    )[:, None]                        # [4, 1, 2, 2]
    w = jnp.tile(base, (C, 1, 1, 1))  # [4*C, 1, 2, 2]
    out = lax.conv_general_dilated(
        x, w, window_strides=(2, 2), padding="VALID",
        dimension_numbers=("NCHW", "OIHW", "NCHW"),
        feature_group_count=C,
    ) / 4.0
    out = out.reshape(B, C, 4, H // 2, W // 2).transpose(0, 2, 1, 3, 4)
    return out.reshape(B, 4 * C, H // 2, W // 2)


def rescale_ref(x, down_num=2):
    out = x
    for _ in range(down_num):
        out = _haar_ds_ref(out)
    return out


if __name__ == "__main__":
    key = jax.random.PRNGKey(0)
    fwd = jax.jit(rescale_forward)

    shapes = [
        (2, 3, 16, 16),     # tiny full-block path (L = S, single chunk)
        (1, 3, 64, 128),    # lane-dense L=128 path, single chunk
        (1, 2, 128, 256),   # lane-dense path + in-kernel fori_loop chunking
    ]
    for i, shp in enumerate(shapes):
        x = jax.random.normal(jax.random.fold_in(key, i), shp, dtype=jnp.float32)
        out = jax.block_until_ready(fwd(x))
        B, C, H, W = shp
        assert out.shape == (B, 16 * C, H // 4, W // 4), out.shape
        ref = rescale_ref(x)
        if not jnp.allclose(out, ref, atol=1e-5, rtol=1e-5):
            raise AssertionError(f"Pallas Rescale output mismatch vs reference for {shp}")

    print("KERNEL_OK")
</pallas_src>

<mosaic_0001>
module attributes {stable_mosaic.version = 11 : i64} {
  func.func @kernel(%arg0: i32, %arg1: i32, %arg2: i32, %arg3: memref<1x1x16x1x16xf32, #tpu.memory_space<vmem>>, %arg4: memref<1x16x1x1x16xf32, #tpu.memory_space<vmem>>) attributes {dimension_semantics = [#tpu.dimension_semantics<parallel>, #tpu.dimension_semantics<parallel>, #tpu.dimension_semantics<parallel>], iteration_bounds = array<i64: 2, 3, 1>, scalar_prefetch = 0 : i64, scratch_operands = 0 : i64, tpu.core_type = #tpu.core_type<tc>, window_params = [{transform_indices = @transform_0, window_bounds = array<i64: 1, 1, 16, 1, 16>}, {transform_indices = @transform_1, window_bounds = array<i64: 1, 16, 1, 1, 16>}]} {
    %c0 = arith.constant 0 : index
    %c0_0 = arith.constant 0 : index
    %c0_1 = arith.constant 0 : index
    %c0_2 = arith.constant 0 : index
    %c0_3 = arith.constant 0 : index
    %0 = vector.load %arg3[%c0, %c0_0, %c0_1, %c0_2, %c0_3] : memref<1x1x16x1x16xf32, #tpu.memory_space<vmem>>, vector<1x1x1x1x16xf32>
    %1 = vector.shape_cast %0 : vector<1x1x1x1x16xf32> to vector<1x16xf32>
    %c0_4 = arith.constant 0 : index
    %c0_5 = arith.constant 0 : index
    %c1 = arith.constant 1 : index
    %c0_6 = arith.constant 0 : index
    %c0_7 = arith.constant 0 : index
    %2 = vector.load %arg3[%c0_4, %c0_5, %c1, %c0_6, %c0_7] : memref<1x1x16x1x16xf32, #tpu.memory_space<vmem>>, vector<1x1x1x1x16xf32>
    %3 = vector.shape_cast %2 : vector<1x1x1x1x16xf32> to vector<1x16xf32>
    %c0_8 = arith.constant 0 : index
    %c0_9 = arith.constant 0 : index
    %c2 = arith.constant 2 : index
    %c0_10 = arith.constant 0 : index
    %c0_11 = arith.constant 0 : index
    %4 = vector.load %arg3[%c0_8, %c0_9, %c2, %c0_10, %c0_11] : memref<1x1x16x1x16xf32, #tpu.memory_space<vmem>>, vector<1x1x1x1x16xf32>
    %5 = vector.shape_cast %4 : vector<1x1x1x1x16xf32> to vector<1x16xf32>
    %c0_12 = arith.constant 0 : index
    %c0_13 = arith.constant 0 : index
    %c3 = arith.constant 3 : index
    %c0_14 = arith.constant 0 : index
    %c0_15 = arith.constant 0 : index
    %6 = vector.load %arg3[%c0_12, %c0_13, %c3, %c0_14, %c0_15] : memref<1x1x16x1x16xf32, #tpu.memory_space<vmem>>, vector<1x1x1x1x16xf32>
    %7 = vector.shape_cast %6 : vector<1x1x1x1x16xf32> to vector<1x16xf32>
    %c0_16 = arith.constant 0 : index
    %c0_17 = arith.constant 0 : index
    %c4 = arith.constant 4 : index
    %c0_18 = arith.constant 0 : index
    %c0_19 = arith.constant 0 : index
    %8 = vector.load %arg3[%c0_16, %c0_17, %c4, %c0_18, %c0_19] : memref<1x1x16x1x16xf32, #tpu.memory_space<vmem>>, vector<1x1x1x1x16xf32>
    %9 = vector.shape_cast %8 : vector<1x1x1x1x16xf32> to vector<1x16xf32>
    %c0_20 = arith.constant 0 : index
    %c0_21 = arith.constant 0 : index
    %c5 = arith.constant 5 : index
    %c0_22 = arith.constant 0 : index
    %c0_23 = arith.constant 0 : index
    %10 = vector.load %arg3[%c0_20, %c0_21, %c5, %c0_22, %c0_23] : memref<1x1x16x1x16xf32, #tpu.memory_space<vmem>>, vector<1x1x1x1x16xf32>
    %11 = vector.shape_cast %10 : vector<1x1x1x1x16xf32> to vector<1x16xf32>
    %c0_24 = arith.constant 0 : index
    %c0_25 = arith.constant 0 : index
    %c6 = arith.constant 6 : index
    %c0_26 = arith.constant 0 : index
    %c0_27 = arith.constant 0 : index
    %12 = vector.load %arg3[%c0_24, %c0_25, %c6, %c0_26, %c0_27] : memref<1x1x16x1x16xf32, #tpu.memory_space<vmem>>, vector<1x1x1x1x16xf32>
    %13 = vector.shape_cast %12 : vector<1x1x1x1x16xf32> to vector<1x16xf32>
    %c0_28 = arith.constant 0 : index
    %c0_29 = arith.constant 0 : index
    %c7 = arith.constant 7 : index
    %c0_30 = arith.constant 0 : index
    %c0_31 = arith.constant 0 : index
    %14 = vector.load %arg3[%c0_28, %c0_29, %c7, %c0_30, %c0_31] : memref<1x1x16x1x16xf32, #tpu.memory_space<vmem>>, vector<1x1x1x1x16xf32>
    %15 = vector.shape_cast %14 : vector<1x1x1x1x16xf32> to vector<1x16xf32>
    %c0_32 = arith.constant 0 : index
    %c0_33 = arith.constant 0 : index
    %c8 = arith.constant 8 : index
    %c0_34 = arith.constant 0 : index
    %c0_35 = arith.constant 0 : index
    %16 = vector.load %arg3[%c0_32, %c0_33, %c8, %c0_34, %c0_35] : memref<1x1x16x1x16xf32, #tpu.memory_space<vmem>>, vector<1x1x1x1x16xf32>
    %17 = vector.shape_cast %16 : vector<1x1x1x1x16xf32> to vector<1x16xf32>
    %c0_36 = arith.constant 0 : index
    %c0_37 = arith.constant 0 : index
    %c9 = arith.constant 9 : index
    %c0_38 = arith.constant 0 : index
    %c0_39 = arith.constant 0 : index
    %18 = vector.load %arg3[%c0_36, %c0_37, %c9, %c0_38, %c0_39] : memref<1x1x16x1x16xf32, #tpu.memory_space<vmem>>, vector<1x1x1x1x16xf32>
    %19 = vector.shape_cast %18 : vector<1x1x1x1x16xf32> to vector<1x16xf32>
    %c0_40 = arith.constant 0 : index
    %c0_41 = arith.constant 0 : index
    %c10 = arith.constant 10 : index
    %c0_42 = arith.constant 0 : index
    %c0_43 = arith.constant 0 : index
    %20 = vector.load %arg3[%c0_40, %c0_41, %c10, %c0_42, %c0_43] : memref<1x1x16x1x16xf32, #tpu.memory_space<vmem>>, vector<1x1x1x1x16xf32>
    %21 = vector.shape_cast %20 : vector<1x1x1x1x16xf32> to vector<1x16xf32>
    %c0_44 = arith.constant 0 : index
    %c0_45 = arith.constant 0 : index
    %c11 = arith.constant 11 : index
    %c0_46 = arith.constant 0 : index
    %c0_47 = arith.constant 0 : index
    %22 = vector.load %arg3[%c0_44, %c0_45, %c11, %c0_46, %c0_47] : memref<1x1x16x1x16xf32, #tpu.memory_space<vmem>>, vector<1x1x1x1x16xf32>
    %23 = vector.shape_cast %22 : vector<1x1x1x1x16xf32> to vector<1x16xf32>
    %c0_48 = arith.constant 0 : index
    %c0_49 = arith.constant 0 : index
    %c12 = arith.constant 12 : index
    %c0_50 = arith.constant 0 : index
    %c0_51 = arith.constant 0 : index
    %24 = vector.load %arg3[%c0_48, %c0_49, %c12, %c0_50, %c0_51] : memref<1x1x16x1x16xf32, #tpu.memory_space<vmem>>, vector<1x1x1x1x16xf32>
    %25 = vector.shape_cast %24 : vector<1x1x1x1x16xf32> to vector<1x16xf32>
    %c0_52 = arith.constant 0 : index
    %c0_53 = arith.constant 0 : index
    %c13 = arith.constant 13 : index
    %c0_54 = arith.constant 0 : index
    %c0_55 = arith.constant 0 : index
    %26 = vector.load %arg3[%c0_52, %c0_53, %c13, %c0_54, %c0_55] : memref<1x1x16x1x16xf32, #tpu.memory_space<vmem>>, vector<1x1x1x1x16xf32>
    %27 = vector.shape_cast %26 : vector<1x1x1x1x16xf32> to vector<1x16xf32>
    %c0_56 = arith.constant 0 : index
    %c0_57 = arith.constant 0 : index
    %c14 = arith.constant 14 : index
    %c0_58 = arith.constant 0 : index
    %c0_59 = arith.constant 0 : index
    %28 = vector.load %arg3[%c0_56, %c0_57, %c14, %c0_58, %c0_59] : memref<1x1x16x1x16xf32, #tpu.memory_space<vmem>>, vector<1x1x1x1x16xf32>
    %29 = vector.shape_cast %28 : vector<1x1x1x1x16xf32> to vector<1x16xf32>
    %c0_60 = arith.constant 0 : index
    %c0_61 = arith.constant 0 : index
    %c15 = arith.constant 15 : index
    %c0_62 = arith.constant 0 : index
    %c0_63 = arith.constant 0 : index
    %30 = vector.load %arg3[%c0_60, %c0_61, %c15, %c0_62, %c0_63] : memref<1x1x16x1x16xf32, #tpu.memory_space<vmem>>, vector<1x1x1x1x16xf32>
    %31 = vector.shape_cast %30 : vector<1x1x1x1x16xf32> to vector<1x16xf32>
    %32 = arith.addf %1, %3 : vector<1x16xf32>
    %33 = arith.subf %1, %3 : vector<1x16xf32>
    %34 = arith.addf %9, %11 : vector<1x16xf32>
    %35 = arith.subf %9, %11 : vector<1x16xf32>
    %36 = arith.addf %32, %34 : vector<1x16xf32>
    %37 = arith.addf %33, %35 : vector<1x16xf32>
    %38 = arith.subf %32, %34 : vector<1x16xf32>
    %39 = arith.subf %33, %35 : vector<1x16xf32>
    %40 = arith.addf %5, %7 : vector<1x16xf32>
    %41 = arith.subf %5, %7 : vector<1x16xf32>
    %42 = arith.addf %13, %15 : vector<1x16xf32>
    %43 = arith.subf %13, %15 : vector<1x16xf32>
    %44 = arith.addf %40, %42 : vector<1x16xf32>
    %45 = arith.addf %41, %43 : vector<1x16xf32>
    %46 = arith.subf %40, %42 : vector<1x16xf32>
    %47 = arith.subf %41, %43 : vector<1x16xf32>
    %48 = arith.addf %17, %19 : vector<1x16xf32>
    %49 = arith.subf %17, %19 : vector<1x16xf32>
    %50 = arith.addf %25, %27 : vector<1x16xf32>
    %51 = arith.subf %25, %27 : vector<1x16xf32>
    %52 = arith.addf %48, %50 : vector<1x16xf32>
    %53 = arith.addf %49, %51 : vector<1x16xf32>
    %54 = arith.subf %48, %50 : vector<1x16xf32>
    %55 = arith.subf %49, %51 : vector<1x16xf32>
    %56 = arith.addf %21, %23 : vector<1x16xf32>
    %57 = arith.subf %21, %23 : vector<1x16xf32>
    %58 = arith.addf %29, %31 : vector<1x16xf32>
    %59 = arith.subf %29, %31 : vector<1x16xf32>
    %60 = arith.addf %56, %58 : vector<1x16xf32>
    %61 = arith.addf %57, %59 : vector<1x16xf32>
    %62 = arith.subf %56, %58 : vector<1x16xf32>
    %63 = arith.subf %57, %59 : vector<1x16xf32>
    %64 = arith.addf %36, %44 : vector<1x16xf32>
    %65 = arith.subf %36, %44 : vector<1x16xf32>
    %66 = arith.addf %52, %60 : vector<1x16xf32>
    %67 = arith.subf %52, %60 : vector<1x16xf32>
    %68 = arith.addf %64, %66 : vector<1x16xf32>
    %69 = arith.addf %65, %67 : vector<1x16xf32>
    %70 = arith.subf %64, %66 : vector<1x16xf32>
    %71 = arith.subf %65, %67 : vector<1x16xf32>
    %cst = arith.constant 6.250000e-02 : f32
    %72 = vector.broadcast %cst : f32 to vector<1x16xf32>
    %73 = arith.mulf %68, %72 : vector<1x16xf32>
    %c0_64 = arith.constant 0 : index
    %c0_65 = arith.constant 0 : index
    %c0_66 = arith.constant 0 : index
    %c0_67 = arith.constant 0 : index
    %c0_68 = arith.constant 0 : index
    %74 = vector.load %arg4[%c0_64, %c0_65, %c0_66, %c0_67, %c0_68] : memref<1x16x1x1x16xf32, #tpu.memory_space<vmem>>, vector<1x1x1x1x16xf32>
    %75 = vector.shape_cast %74 : vector<1x1x1x1x16xf32> to vector<1x16xf32>
    %76 = vector.shape_cast %73 : vector<1x16xf32> to vector<1x1x1x1x16xf32>
    tpu.vector_store %arg4[%c0_64, %c0_65, %c0_66, %c0_67, %c0_68], %76 {strides = array<i32>} : memref<1x16x1x1x16xf32, #tpu.memory_space<vmem>>, vector<1x1x1x1x16xf32>,
    %cst_69 = arith.constant 6.250000e-02 : f32
    %77 = vector.broadcast %cst_69 : f32 to vector<1x16xf32>
    %78 = arith.mulf %69, %77 : vector<1x16xf32>
    %c0_70 = arith.constant 0 : index
    %c4_71 = arith.constant 4 : index
    %c0_72 = arith.constant 0 : index
    %c0_73 = arith.constant 0 : index
    %c0_74 = arith.constant 0 : index
    %79 = vector.load %arg4[%c0_70, %c4_71, %c0_72, %c0_73, %c0_74] : memref<1x16x1x1x16xf32, #tpu.memory_space<vmem>>, vector<1x1x1x1x16xf32>
    %80 = vector.shape_cast %79 : vector<1x1x1x1x16xf32> to vector<1x16xf32>
    %81 = vector.shape_cast %78 : vector<1x16xf32> to vector<1x1x1x1x16xf32>
    tpu.vector_store %arg4[%c0_70, %c4_71, %c0_72, %c0_73, %c0_74], %81 {strides = array<i32>} : memref<1x16x1x1x16xf32, #tpu.memory_space<vmem>>, vector<1x1x1x1x16xf32>,
    %cst_75 = arith.constant 6.250000e-02 : f32
    %82 = vector.broadcast %cst_75 : f32 to vector<1x16xf32>
    %83 = arith.mulf %70, %82 : vector<1x16xf32>
    %c0_76 = arith.constant 0 : index
    %c8_77 = arith.constant 8 : index
    %c0_78 = arith.constant 0 : index
    %c0_79 = arith.constant 0 : index
    %c0_80 = arith.constant 0 : index
    %84 = vector.load %arg4[%c0_76, %c8_77, %c0_78, %c0_79, %c0_80] : memref<1x16x1x1x16xf32, #tpu.memory_space<vmem>>, vector<1x1x1x1x16xf32>
    %85 = vector.shape_cast %84 : vector<1x1x1x1x16xf32> to vector<1x16xf32>
    %86 = vector.shape_cast %83 : vector<1x16xf32> to vector<1x1x1x1x16xf32>
    tpu.vector_store %arg4[%c0_76, %c8_77, %c0_78, %c0_79, %c0_80], %86 {strides = array<i32>} : memref<1x16x1x1x16xf32, #tpu.memory_space<vmem>>, vector<1x1x1x1x16xf32>,
    %cst_81 = arith.constant 6.250000e-02 : f32
    %87 = vector.broadcast %cst_81 : f32 to vector<1x16xf32>
    %88 = arith.mulf %71, %87 : vector<1x16xf32>
    %c0_82 = arith.constant 0 : index
    %c12_83 = arith.constant 12 : index
    %c0_84 = arith.constant 0 : index
    %c0_85 = arith.constant 0 : index
    %c0_86 = arith.constant 0 : index
    %89 = vector.load %arg4[%c0_82, %c12_83, %c0_84, %c0_85, %c0_86] : memref<1x16x1x1x16xf32, #tpu.memory_space<vmem>>, vector<1x1x1x1x16xf32>
    %90 = vector.shape_cast %89 : vector<1x1x1x1x16xf32> to vector<1x16xf32>
    %91 = vector.shape_cast %88 : vector<1x16xf32> to vector<1x1x1x1x16xf32>
    tpu.vector_store %arg4[%c0_82, %c12_83, %c0_84, %c0_85, %c0_86], %91 {strides = array<i32>} : memref<1x16x1x1x16xf32, #tpu.memory_space<vmem>>, vector<1x1x1x1x16xf32>,
    %92 = arith.addf %37, %45 : vector<1x16xf32>
    %93 = arith.subf %37, %45 : vector<1x16xf32>
    %94 = arith.addf %53, %61 : vector<1x16xf32>
    %95 = arith.subf %53, %61 : vector<1x16xf32>
    %96 = arith.addf %92, %94 : vector<1x16xf32>
    %97 = arith.addf %93, %95 : vector<1x16xf32>
    %98 = arith.subf %92, %94 : vector<1x16xf32>
    %99 = arith.subf %93, %95 : vector<1x16xf32>
    %cst_87 = arith.constant 6.250000e-02 : f32
    %100 = vector.broadcast %cst_87 : f32 to vector<1x16xf32>
    %101 = arith.mulf %96, %100 : vector<1x16xf32>
    %c0_88 = arith.constant 0 : index
    %c1_89 = arith.constant 1 : index
    %c0_90 = arith.constant 0 : index
    %c0_91 = arith.constant 0 : index
    %c0_92 = arith.constant 0 : index
    %102 = vector.load %arg4[%c0_88, %c1_89, %c0_90, %c0_91, %c0_92] : memref<1x16x1x1x16xf32, #tpu.memory_space<vmem>>, vector<1x1x1x1x16xf32>
    %103 = vector.shape_cast %102 : vector<1x1x1x1x16xf32> to vector<1x16xf32>
    %104 = vector.shape_cast %101 : vector<1x16xf32> to vector<1x1x1x1x16xf32>
    tpu.vector_store %arg4[%c0_88, %c1_89, %c0_90, %c0_91, %c0_92], %104 {strides = array<i32>} : memref<1x16x1x1x16xf32, #tpu.memory_space<vmem>>, vector<1x1x1x1x16xf32>,
    %cst_93 = arith.constant 6.250000e-02 : f32
    %105 = vector.broadcast %cst_93 : f32 to vector<1x16xf32>
    %106 = arith.mulf %97, %105 : vector<1x16xf32>
    %c0_94 = arith.constant 0 : index
    %c5_95 = arith.constant 5 : index
    %c0_96 = arith.constant 0 : index
    %c0_97 = arith.constant 0 : index
    %c0_98 = arith.constant 0 : index
    %107 = vector.load %arg4[%c0_94, %c5_95, %c0_96, %c0_97, %c0_98] : memref<1x16x1x1x16xf32, #tpu.memory_space<vmem>>, vector<1x1x1x1x16xf32>
    %108 = vector.shape_cast %107 : vector<1x1x1x1x16xf32> to vector<1x16xf32>
    %109 = vector.shape_cast %106 : vector<1x16xf32> to vector<1x1x1x1x16xf32>
    tpu.vector_store %arg4[%c0_94, %c5_95, %c0_96, %c0_97, %c0_98], %109 {strides = array<i32>} : memref<1x16x1x1x16xf32, #tpu.memory_space<vmem>>, vector<1x1x1x1x16xf32>,
    %cst_99 = arith.constant 6.250000e-02 : f32
    %110 = vector.broadcast %cst_99 : f32 to vector<1x16xf32>
    %111 = arith.mulf %98, %110 : vector<1x16xf32>
    %c0_100 = arith.constant 0 : index
    %c9_101 = arith.constant 9 : index
    %c0_102 = arith.constant 0 : index
    %c0_103 = arith.constant 0 : index
    %c0_104 = arith.constant 0 : index
    %112 = vector.load %arg4[%c0_100, %c9_101, %c0_102, %c0_103, %c0_104] : memref<1x16x1x1x16xf32, #tpu.memory_space<vmem>>, vector<1x1x1x1x16xf32>
    %113 = vector.shape_cast %112 : vector<1x1x1x1x16xf32> to vector<1x16xf32>
    %114 = vector.shape_cast %111 : vector<1x16xf32> to vector<1x1x1x1x16xf32>
    tpu.vector_store %arg4[%c0_100, %c9_101, %c0_102, %c0_103, %c0_104], %114 {strides = array<i32>} : memref<1x16x1x1x16xf32, #tpu.memory_space<vmem>>, vector<1x1x1x1x16xf32>,
    %cst_105 = arith.constant 6.250000e-02 : f32
    %115 = vector.broadcast %cst_105 : f32 to vector<1x16xf32>
    %116 = arith.mulf %99, %115 : vector<1x16xf32>
    %c0_106 = arith.constant 0 : index
    %c13_107 = arith.constant 13 : index
    %c0_108 = arith.constant 0 : index
    %c0_109 = arith.constant 0 : index
    %c0_110 = arith.constant 0 : index
    %117 = vector.load %arg4[%c0_106, %c13_107, %c0_108, %c0_109, %c0_110] : memref<1x16x1x1x16xf32, #tpu.memory_space<vmem>>, vector<1x1x1x1x16xf32>
    %118 = vector.shape_cast %117 : vector<1x1x1x1x16xf32> to vector<1x16xf32>
    %119 = vector.shape_cast %116 : vector<1x16xf32> to vector<1x1x1x1x16xf32>
    tpu.vector_store %arg4[%c0_106, %c13_107, %c0_108, %c0_109, %c0_110], %119 {strides = array<i32>} : memref<1x16x1x1x16xf32, #tpu.memory_space<vmem>>, vector<1x1x1x1x16xf32>,
    %120 = arith.addf %38, %46 : vector<1x16xf32>
    %121 = arith.subf %38, %46 : vector<1x16xf32>
    %122 = arith.addf %54, %62 : vector<1x16xf32>
    %123 = arith.subf %54, %62 : vector<1x16xf32>
    %124 = arith.addf %120, %122 : vector<1x16xf32>
    %125 = arith.addf %121, %123 : vector<1x16xf32>
    %126 = arith.subf %120, %122 : vector<1x16xf32>
    %127 = arith.subf %121, %123 : vector<1x16xf32>
    %cst_111 = arith.constant 6.250000e-02 : f32
    %128 = vector.broadcast %cst_111 : f32 to vector<1x16xf32>
    %129 = arith.mulf %124, %128 : vector<1x16xf32>
    %c0_112 = arith.constant 0 : index
    %c2_113 = arith.constant 2 : index
    %c0_114 = arith.constant 0 : index
    %c0_115 = arith.constant 0 : index
    %c0_116 = arith.constant 0 : index
    %130 = vector.load %arg4[%c0_112, %c2_113, %c0_114, %c0_115, %c0_116] : memref<1x16x1x1x16xf32, #tpu.memory_space<vmem>>, vector<1x1x1x1x16xf32>
    %131 = vector.shape_cast %130 : vector<1x1x1x1x16xf32> to vector<1x16xf32>
    %132 = vector.shape_cast %129 : vector<1x16xf32> to vector<1x1x1x1x16xf32>
    tpu.vector_store %arg4[%c0_112, %c2_113, %c0_114, %c0_115, %c0_116], %132 {strides = array<i32>} : memref<1x16x1x1x16xf32, #tpu.memory_space<vmem>>, vector<1x1x1x1x16xf32>,
    %cst_117 = arith.constant 6.250000e-02 : f32
    %133 = vector.broadcast %cst_117 : f32 to vector<1x16xf32>
    %134 = arith.mulf %125, %133 : vector<1x16xf32>
    %c0_118 = arith.constant 0 : index
    %c6_119 = arith.constant 6 : index
    %c0_120 = arith.constant 0 : index
    %c0_121 = arith.constant 0 : index
    %c0_122 = arith.constant 0 : index
    %135 = vector.load %arg4[%c0_118, %c6_119, %c0_120, %c0_121, %c0_122] : memref<1x16x1x1x16xf32, #tpu.memory_space<vmem>>, vector<1x1x1x1x16xf32>
    %136 = vector.shape_cast %135 : vector<1x1x1x1x16xf32> to vector<1x16xf32>
    %137 = vector.shape_cast %134 : vector<1x16xf32> to vector<1x1x1x1x16xf32>
    tpu.vector_store %arg4[%c0_118, %c6_119, %c0_120, %c0_121, %c0_122], %137 {strides = array<i32>} : memref<1x16x1x1x16xf32, #tpu.memory_space<vmem>>, vector<1x1x1x1x16xf32>,
    %cst_123 = arith.constant 6.250000e-02 : f32
    %138 = vector.broadcast %cst_123 : f32 to vector<1x16xf32>
    %139 = arith.mulf %126, %138 : vector<1x16xf32>
    %c0_124 = arith.constant 0 : index
    %c10_125 = arith.constant 10 : index
    %c0_126 = arith.constant 0 : index
    %c0_127 = arith.constant 0 : index
    %c0_128 = arith.constant 0 : index
    %140 = vector.load %arg4[%c0_124, %c10_125, %c0_126, %c0_127, %c0_128] : memref<1x16x1x1x16xf32, #tpu.memory_space<vmem>>, vector<1x1x1x1x16xf32>
    %141 = vector.shape_cast %140 : vector<1x1x1x1x16xf32> to vector<1x16xf32>
    %142 = vector.shape_cast %139 : vector<1x16xf32> to vector<1x1x1x1x16xf32>
    tpu.vector_store %arg4[%c0_124, %c10_125, %c0_126, %c0_127, %c0_128], %142 {strides = array<i32>} : memref<1x16x1x1x16xf32, #tpu.memory_space<vmem>>, vector<1x1x1x1x16xf32>,
    %cst_129 = arith.constant 6.250000e-02 : f32
    %143 = vector.broadcast %cst_129 : f32 to vector<1x16xf32>
    %144 = arith.mulf %127, %143 : vector<1x16xf32>
    %c0_130 = arith.constant 0 : index
    %c14_131 = arith.constant 14 : index
    %c0_132 = arith.constant 0 : index
    %c0_133 = arith.constant 0 : index
    %c0_134 = arith.constant 0 : index
    %145 = vector.load %arg4[%c0_130, %c14_131, %c0_132, %c0_133, %c0_134] : memref<1x16x1x1x16xf32, #tpu.memory_space<vmem>>, vector<1x1x1x1x16xf32>
    %146 = vector.shape_cast %145 : vector<1x1x1x1x16xf32> to vector<1x16xf32>
    %147 = vector.shape_cast %144 : vector<1x16xf32> to vector<1x1x1x1x16xf32>
    tpu.vector_store %arg4[%c0_130, %c14_131, %c0_132, %c0_133, %c0_134], %147 {strides = array<i32>} : memref<1x16x1x1x16xf32, #tpu.memory_space<vmem>>, vector<1x1x1x1x16xf32>,
    %148 = arith.addf %39, %47 : vector<1x16xf32>
    %149 = arith.subf %39, %47 : vector<1x16xf32>
    %150 = arith.addf %55, %63 : vector<1x16xf32>
    %151 = arith.subf %55, %63 : vector<1x16xf32>
    %152 = arith.addf %148, %150 : vector<1x16xf32>
    %153 = arith.addf %149, %151 : vector<1x16xf32>
    %154 = arith.subf %148, %150 : vector<1x16xf32>
    %155 = arith.subf %149, %151 : vector<1x16xf32>
    %cst_135 = arith.constant 6.250000e-02 : f32
    %156 = vector.broadcast %cst_135 : f32 to vector<1x16xf32>
    %157 = arith.mulf %152, %156 : vector<1x16xf32>
    %c0_136 = arith.constant 0 : index
    %c3_137 = arith.constant 3 : index
    %c0_138 = arith.constant 0 : index
    %c0_139 = arith.constant 0 : index
    %c0_140 = arith.constant 0 : index
    %158 = vector.load %arg4[%c0_136, %c3_137, %c0_138, %c0_139, %c0_140] : memref<1x16x1x1x16xf32, #tpu.memory_space<vmem>>, vector<1x1x1x1x16xf32>
    %159 = vector.shape_cast %158 : vector<1x1x1x1x16xf32> to vector<1x16xf32>
    %160 = vector.shape_cast %157 : vector<1x16xf32> to vector<1x1x1x1x16xf32>
    tpu.vector_store %arg4[%c0_136, %c3_137, %c0_138, %c0_139, %c0_140], %160 {strides = array<i32>} : memref<1x16x1x1x16xf32, #tpu.memory_space<vmem>>, vector<1x1x1x1x16xf32>,
    %cst_141 = arith.constant 6.250000e-02 : f32
    %161 = vector.broadcast %cst_141 : f32 to vector<1x16xf32>
    %162 = arith.mulf %153, %161 : vector<1x16xf32>
    %c0_142 = arith.constant 0 : index
    %c7_143 = arith.constant 7 : index
    %c0_144 = arith.constant 0 : index
    %c0_145 = arith.constant 0 : index
    %c0_146 = arith.constant 0 : index
    %163 = vector.load %arg4[%c0_142, %c7_143, %c0_144, %c0_145, %c0_146] : memref<1x16x1x1x16xf32, #tpu.memory_space<vmem>>, vector<1x1x1x1x16xf32>
    %164 = vector.shape_cast %163 : vector<1x1x1x1x16xf32> to vector<1x16xf32>
    %165 = vector.shape_cast %162 : vector<1x16xf32> to vector<1x1x1x1x16xf32>
    tpu.vector_store %arg4[%c0_142, %c7_143, %c0_144, %c0_145, %c0_146], %165 {strides = array<i32>} : memref<1x16x1x1x16xf32, #tpu.memory_space<vmem>>, vector<1x1x1x1x16xf32>,
    %cst_147 = arith.constant 6.250000e-02 : f32
    %166 = vector.broadcast %cst_147 : f32 to vector<1x16xf32>
    %167 = arith.mulf %154, %166 : vector<1x16xf32>
    %c0_148 = arith.constant 0 : index
    %c11_149 = arith.constant 11 : index
    %c0_150 = arith.constant 0 : index
    %c0_151 = arith.constant 0 : index
    %c0_152 = arith.constant 0 : index
    %168 = vector.load %arg4[%c0_148, %c11_149, %c0_150, %c0_151, %c0_152] : memref<1x16x1x1x16xf32, #tpu.memory_space<vmem>>, vector<1x1x1x1x16xf32>
    %169 = vector.shape_cast %168 : vector<1x1x1x1x16xf32> to vector<1x16xf32>
    %170 = vector.shape_cast %167 : vector<1x16xf32> to vector<1x1x1x1x16xf32>
    tpu.vector_store %arg4[%c0_148, %c11_149, %c0_150, %c0_151, %c0_152], %170 {strides = array<i32>} : memref<1x16x1x1x16xf32, #tpu.memory_space<vmem>>, vector<1x1x1x1x16xf32>,
    %cst_153 = arith.constant 6.250000e-02 : f32
    %171 = vector.broadcast %cst_153 : f32 to vector<1x16xf32>
    %172 = arith.mulf %155, %171 : vector<1x16xf32>
    %c0_154 = arith.constant 0 : index
    %c15_155 = arith.constant 15 : index
    %c0_156 = arith.constant 0 : index
    %c0_157 = arith.constant 0 : index
    %c0_158 = arith.constant 0 : index
    %173 = vector.load %arg4[%c0_154, %c15_155, %c0_156, %c0_157, %c0_158] : memref<1x16x1x1x16xf32, #tpu.memory_space<vmem>>, vector<1x1x1x1x16xf32>
    %174 = vector.shape_cast %173 : vector<1x1x1x1x16xf32> to vector<1x16xf32>
    %175 = vector.shape_cast %172 : vector<1x16xf32> to vector<1x1x1x1x16xf32>
    tpu.vector_store %arg4[%c0_154, %c15_155, %c0_156, %c0_157, %c0_158], %175 {strides = array<i32>} : memref<1x16x1x1x16xf32, #tpu.memory_space<vmem>>, vector<1x1x1x1x16xf32>,
    return
  }
  func.func @transform_0(%arg0: i32, %arg1: i32, %arg2: i32) -> (i32, i32, i32, i32, i32) {
    %c0_i32 = arith.constant 0 : i32
    %c0_i32_0 = arith.constant 0 : i32
    %c0_i32_1 = arith.constant 0 : i32
    return %arg0, %arg1, %c0_i32, %arg2, %c0_i32_0 : i32, i32, i32, i32, i32
  }
  func.func @transform_1(%arg0: i32, %arg1: i32, %arg2: i32) -> (i32, i32, i32, i32, i32) {
    %c0_i32 = arith.constant 0 : i32
    %c0_i32_0 = arith.constant 0 : i32
    %c0_i32_1 = arith.constant 0 : i32
    return %arg0, %c0_i32, %arg1, %arg2, %c0_i32_0 : i32, i32, i32, i32, i32
  }
}

</mosaic_0001>

<bundles_post_ra>
// kernel: rescale_forward.1
= control target key start
LH: loop header
LB: loop body
LE: loop exit
PB: predicated region body
PF: predicated region fallthrough
CT: control target
= control target key end

     0   :  { %s651_s6 = smov 0   ;;  %s653_s7 = smov 0   ;;  %s812_s0 = inlined_call_operand.vmem [shape: f32[2,3,16,1,16], index: 0, kind: input, shape index: {}]   ;;  %s813_s1 = inlined_call_operand.vmem [shape: f32[2,16,3,1,16], index: 1, kind: output, shape index: {}]  }
   0x1   :  { %s655_s8 = smov 0   ;;  %s657_s9 = smov 0  }
   0x2   :  { %s659_s10 = smov 0   ;;  %s661_s11 = smov 0  }
   0x3   :  { %s663_s12 = smov 0  }
   0x4 LB: > { %s26_s13 = sadd.s32 1, %s631_s10  ;;  %s30_s14 = sadd.s32 1, %s635_s11  ;;  %s639_s12 = sphi %s663_s12, %s11_s12   ;;  %s635_s11 = sphi %s661_s11, %s820_s11   ;;  %s631_s10 = sphi %s659_s10, %s819_s10   ;;  %s627_s9 = sphi %s657_s9, %s818_s9   ;;  %s623_s8 = sphi %s655_s8, %s817_s8   ;;  %s619_s7 = sphi %s653_s7, %s816_s7   ;;  %s615_s6 = sphi %s651_s6, %s815_s6  }
   0x5   : > { %p28_p0 = scmp.ge.s32.totalorder %s26_s13, 3  ;;  %s487_s15 = sadd.s32 4294967295, %s639_s12  }
   0x6   : > { %p81_p1 = scmp.ne.s32.totalorder %s619_s7, %s615_s6  ;;  %p82_p2 = scmp.eq.s32.totalorder %s487_s15, 5 }
   0x7   : > { %s822_s13 = smov (%p28_p0, %s26_s13), 0  ;;  %s824_s14 = smov (!%p28_p0, %s30_s14), %s635_s11 }
   0x8   : > { %s65_s16 = ssub.s32 %s631_s10, %s822_s13  ;;  %p32_p3 = scmp.ge.s32.totalorder %s824_s14, 2 }
   0x9   : > { %p491_p4 = scmp.ge.s32.totalorder %s639_s12, 1  ;;  %p697_p5 = por %p82_p2, %p81_p1 }
   0xa   : > { %p120_p6 = scmp.lt.s32.totalorder %s639_s12, 7  ;;  %s826_s14 = smov (%p32_p3, %s824_s14), 0 }
   0xb   : > { %s64_s18 = ssub.s32 %s635_s11, %s826_s14  ;;  %s71_s20 = sadd.s32 1, %s619_s7 }
   0xc   : > { %p121_p7 = pnand %p491_p4, %p120_p6  ;;  %s66_s19 = sor.u32 %s65_s16, %s64_s18 }
   0xd   : > { %p69_p8 = scmp.eq.s32.totalorder %s66_s19, 0  ;;  %p145_p9 = scmp.lt.s32.totalorder (!%p121_p7), %s627_s9, 1 }
   0xe   : > { %124 = sbr.rel (%p121_p7) target bundleno = 62 (0x3e), region = 24  ;;  %p147_p10 = scmp.lt.s32.totalorder (!%p121_p7), %s623_s8, 2 }
   0xf   : > { %s708_s21 = scalar_select %p69_p8, %s619_s7, %s71_s20  }
  0x10   : > { %s142_s30 = sand.u32 (!%p121_p7), 1, %s615_s6  }
  0x11   : > { %s492_s2 = sshll.u32 (!%p121_p7), %s142_s30, 4 }
  0x12   : > { %s730_s3 = scalar_lea.vmem (!%p121_p7), [#allocation2], %s492_s2 }
  0x13   : > { %s146_s22 = scalar_select %p145_p9, %s627_s9, 1  ;;  %vm228_vm0 = vcmask 122880  }
  0x14   : > { %s148_s23 = scalar_select %p147_p10, %s623_s8, 2 }
  0x15   : > { %s527_s24 = smul.u32 48, %s146_s22 }
  0x16   : > { %s493_s25 = sshll.u32 %s148_s23, 4  ;;  %s528_s4 = smul.u32 (%p697_p5), 48, %s627_s9 }
  0x17   : > { %s154_s26 = sadd.s32 %s527_s24, %s493_s25 }
  0x18   : > { %s155_s29 = scalar_lea.vmem %s812_s0, %s154_s26  ;;  %s308_s5 = sadd.s32 (%p697_p5), %s623_s8, %s528_s4 }
  0x19   : > { %v156_v0 = vld [vmem:[%s155_s29] sm:$0x1]  ;;  %v494_v1 = vld [vmem:[%s155_s29 + $0x1] sm:$0x1]  ;;  %v495_v2 = vld [vmem:[%s155_s29 + $0x2] sm:$0x1]  ;;  %s309_s16 = scalar_lea.vmem (%p697_p5), %s813_s1, %s308_s5 }
  0x1a   : > { %v496_v3 = vld [vmem:[%s155_s29 + $0x3] sm:$0x1]  ;;  %v497_v4 = vld [vmem:[%s155_s29 + $0x4] sm:$0x1]  ;;  %v498_v5 = vld [vmem:[%s155_s29 + $0x5] sm:$0x1]  ;;  %v187_v6 = vadd.f32 %v494_v1, %v156_v0  ;;  %v717_v7 = vsub.f32 %v156_v0, %v494_v1 }
  0x1b   : > { %v499_v8 = vld [vmem:[%s155_s29 + $0x6] sm:$0x1]  ;;  %v500_v9 = vld [vmem:[%s155_s29 + $0x7] sm:$0x1]  ;;  %v501_v10 = vld [vmem:[%s155_s29 + $0x8] sm:$0x1]  ;;  %v189_v11 = vadd.f32 %v498_v5, %v497_v4  ;;  %v195_v12 = vadd.f32 %v496_v3, %v495_v2  ;;  %v719_v13 = vsub.f32 %v497_v4, %v498_v5  ;;  %v721_v14 = vsub.f32 %v495_v2, %v496_v3 }
  0x1c   : > { %v502_v15 = vld [vmem:[%s155_s29 + $0x9] sm:$0x1]  ;;  %v503_v16 = vld [vmem:[%s155_s29 + $0xa] sm:$0x1]  ;;  %v504_v17 = vld [vmem:[%s155_s29 + $0xb] sm:$0x1]  ;;  %v197_v18 = vadd.f32 %v500_v9, %v499_v8  ;;  %v723_v19 = vsub.f32 %v499_v8, %v500_v9 }
  0x1d   : > { %v505_v20 = vld [vmem:[%s155_s29 + $0xc] sm:$0x1]  ;;  %v506_v21 = vld [vmem:[%s155_s29 + $0xd] sm:$0x1]  ;;  %v507_v22 = vld [vmem:[%s155_s29 + $0xe] sm:$0x1]  ;;  %v191_v23 = vadd.f32 %v189_v11, %v187_v6  ;;  %v203_v24 = vadd.f32 %v502_v15, %v501_v10  ;;  %v211_v25 = vadd.f32 %v504_v17, %v503_v16  ;;  %v192_v26 = vadd.f32 %v719_v13, %v717_v7 }
  0x1e   : > { %v508_v27 = vld [vmem:[%s155_s29 + $0xf] sm:$0x1]  ;;  %v199_v28 = vadd.f32 %v197_v18, %v195_v12  ;;  %v205_v29 = vadd.f32 %v506_v21, %v505_v20  ;;  %v200_v30 = vadd.f32 %v723_v19, %v721_v14  ;;  %v204_v31 = vsub.f32 %v501_v10, %v502_v15 }
  0x1f   : > { %v213_v32 = vadd.f32 %v508_v27, %v507_v22  ;;  %v206_v33 = vsub.f32 %v505_v20, %v506_v21  ;;  %v212_v34 = vsub.f32 %v503_v16, %v504_v17  ;;  %v214_v35 = vsub.f32 %v507_v22, %v508_v27 }
  0x20   : > { %v207_v36 = vadd.f32 %v205_v29, %v203_v24  ;;  %v219_v37 = vadd.f32 %v199_v28, %v191_v23  ;;  %v220_v38 = vsub.f32 %v191_v23, %v199_v28  ;;  %v239_v39 = vadd.f32 %v200_v30, %v192_v26 }
  0x21   : > { %v215_v40 = vadd.f32 %v213_v32, %v211_v25  ;;  %v208_v41 = vadd.f32 %v206_v33, %v204_v31  ;;  %v216_v42 = vadd.f32 %v214_v35, %v212_v34  ;;  %v240_v43 = vsub.f32 %v192_v26, %v200_v30 }
  0x22   : > { %v193_v44 = vsub.f32 %v187_v6, %v189_v11  ;;  %v201_v45 = vsub.f32 %v195_v12, %v197_v18  ;;  %v209_v46 = vsub.f32 %v203_v24, %v205_v29  ;;  %v217_v47 = vsub.f32 %v211_v25, %v213_v32 }
  0x23   : > { %v221_v48 = vadd.f32 %v215_v40, %v207_v36  ;;  %v222_v49 = vsub.f32 %v207_v36, %v215_v40  ;;  %v241_v50 = vadd.f32 %v216_v42, %v208_v41  ;;  %v242_v51 = vsub.f32 %v208_v41, %v216_v42 }
  0x24   : > { %v259_v52 = vadd.f32 %v201_v45, %v193_v44  ;;  %v261_v53 = vadd.f32 %v217_v47, %v209_v46  ;;  %v260_v54 = vsub.f32 %v193_v44, %v201_v45  ;;  %v262_v55 = vsub.f32 %v209_v46, %v217_v47 }
  0x25   : > { %v223_v56 = vadd.f32 %v221_v48, %v219_v37  ;;  %v224_v57 = vadd.f32 %v222_v49, %v220_v38  ;;  %v225_v58 = vsub.f32 %v219_v37, %v221_v48  ;;  %v226_v59 = vsub.f32 %v220_v38, %v222_v49 }
  0x26   : > { %v243_v60 = vadd.f32 %v241_v50, %v239_v39  ;;  %v244_v61 = vadd.f32 %v242_v51, %v240_v43  ;;  %v245_v62 = vsub.f32 %v239_v39, %v241_v50  ;;  %v246_v63 = vsub.f32 %v240_v43, %v242_v51 }
  0x27   : > { %v227_v0 = vmul.f32 0.0625, %v223_v56  ;;  %v230_v1 = vmul.f32 0.0625, %v224_v57  ;;  %v233_v2 = vmul.f32 0.0625, %v225_v58  ;;  %v236_v3 = vmul.f32 0.0625, %v226_v59 }
  0x28   : > { %v247_v4 = vmul.f32 0.0625, %v243_v60  ;;  %v250_v5 = vmul.f32 0.0625, %v244_v61  ;;  %v253_v6 = vmul.f32 0.0625, %v245_v62  ;;  %v256_v8 = vmul.f32 0.0625, %v246_v63 }
  0x29   : > { %229 = vst.msk [vmem:[%s730_s3] sm:$0x1] %vm228_vm0, %v227_v0  ;;  %509 = vst.msk [vmem:[%s730_s3 + $0x4] sm:$0x1] %vm228_vm0, %v230_v1  ;;  %v263_v9 = vadd.f32 %v261_v53, %v259_v52  ;;  %v264_v10 = vadd.f32 %v262_v55, %v260_v54  ;;  %v265_v11 = vsub.f32 %v259_v52, %v261_v53 }
  0x2a   : > { %510 = vst.msk [vmem:[%s730_s3 + $0x8] sm:$0x1] %vm228_vm0, %v233_v2  ;;  %511 = vst.msk [vmem:[%s730_s3 + $0xc] sm:$0x1] %vm228_vm0, %v236_v3  ;;  %v266_v12 = vsub.f32 %v260_v54, %v262_v55  ;;  %v194_v15 = vsub.f32 %v717_v7, %v719_v13  ;;  %v202_v16 = vsub.f32 %v721_v14, %v723_v19 }
  0x2b   : > { %512 = vst.msk [vmem:[%s730_s3 + $0x1] sm:$0x1] %vm228_vm0, %v247_v4  ;;  %513 = vst.msk [vmem:[%s730_s3 + $0x5] sm:$0x1] %vm228_vm0, %v250_v5  ;;  %v210_v17 = vsub.f32 %v204_v31, %v206_v33  ;;  %v218_v18 = vsub.f32 %v212_v34, %v214_v35  ;;  %v267_v20 = vmul.f32 0.0625, %v263_v9  ;;  %v270_v21 = vmul.f32 0.0625, %v264_v10 }
  0x2c   : > { %514 = vst.msk [vmem:[%s730_s3 + $0x9] sm:$0x1] %vm228_vm0, %v253_v6  ;;  %515 = vst.msk [vmem:[%s730_s3 + $0xd] sm:$0x1] %vm228_vm0, %v256_v8  ;;  %v273_v22 = vmul.f32 0.0625, %v265_v11  ;;  %v276_v23 = vmul.f32 0.0625, %v266_v12  ;;  %v279_v24 = vadd.f32 %v202_v16, %v194_v15  ;;  %v280_v26 = vsub.f32 %v194_v15, %v202_v16 }
  0x2d   : > { %v281_v25 = vadd.f32 %v218_v18, %v210_v17  ;;  %v282_v27 = vsub.f32 %v210_v17, %v218_v18  ;;  %516 = vst.msk [vmem:[%s730_s3 + $0x2] sm:$0x1] %vm228_vm0, %v267_v20  ;;  %517 = vst.msk [vmem:[%s730_s3 + $0x6] sm:$0x1] %vm228_vm0, %v270_v21 }
  0x2e   : > { %518 = vst.msk [vmem:[%s730_s3 + $0xa] sm:$0x1] %vm228_vm0, %v273_v22  ;;  %519 = vst.msk [vmem:[%s730_s3 + $0xe] sm:$0x1] %vm228_vm0, %v276_v23 }
  0x2f   : > { %v283_v7 = vadd.f32 %v281_v25, %v279_v24  ;;  %v284_v13 = vadd.f32 %v282_v27, %v280_v26  ;;  %v285_v14 = vsub.f32 %v279_v24, %v281_v25  ;;  %v286_v19 = vsub.f32 %v280_v26, %v282_v27 }
  0x30   : > { %305 = sbr.rel (!%p697_p5) target bundleno = 62 (0x3e), region = 28  ;;  %v326_v32 = vld [vmem:[%s730_s3] sm:$0x1] (%p697_p5)  ;;  %v334_v36 = vld [vmem:[%s730_s3 + $0x4] sm:$0x1] (%p697_p5) }
  0x31   : > { %v287_v28 = vmul.f32 0.0625, %v283_v7  ;;  %v290_v29 = vmul.f32 0.0625, %v284_v13  ;;  %v293_v30 = vmul.f32 0.0625, %v285_v14  ;;  %v296_v31 = vmul.f32 0.0625, %v286_v19  ;;  %v342_v40 = vld [vmem:[%s730_s3 + $0x8] sm:$0x1] (%p697_p5) }
  0x32   : > { %v328_v33 = vld [vmem:[%s730_s3 + $0x1] sm:$0x1] (%p697_p5)  ;;  %v336_v37 = vld [vmem:[%s730_s3 + $0x5] sm:$0x1] (%p697_p5)  ;;  %327 = vst [vmem:[%s309_s16] sm:$0x1] (%p697_p5), %v326_v32 }
  0x33   : > { %520 = vst.msk [vmem:[%s730_s3 + $0x3] sm:$0x1] %vm228_vm0, %v287_v28  ;;  %521 = vst.msk [vmem:[%s730_s3 + $0x7] sm:$0x1] %vm228_vm0, %v290_v29  ;;  %v344_v41 = vld [vmem:[%s730_s3 + $0x9] sm:$0x1] (%p697_p5) }
  0x34   : > { %522 = vst.msk [vmem:[%s730_s3 + $0xb] sm:$0x1] %vm228_vm0, %v293_v30  ;;  %523 = vst.msk [vmem:[%s730_s3 + $0xf] sm:$0x1] %vm228_vm0, %v296_v31  ;;  %v330_v34 = vld [vmem:[%s730_s3 + $0x2] sm:$0x1] (%p697_p5) }
  0x35   : > { %v338_v38 = vld [vmem:[%s730_s3 + $0x6] sm:$0x1]  ;;  %v346_v42 = vld [vmem:[%s730_s3 + $0xa] sm:$0x1]  ;;  %329 = vst [vmem:[%s309_s16 + $0x3] sm:$0x1] %v328_v33 }
  0x36   : > { %331 = vst [vmem:[%s309_s16 + $0x6] sm:$0x1] %v330_v34  ;;  %335 = vst [vmem:[%s309_s16 + $0xc] sm:$0x1] %v334_v36  ;;  %v350_v44 = vld [vmem:[%s730_s3 + $0xc] sm:$0x1] }
  0x37   : > { %337 = vst [vmem:[%s309_s16 + $0xf] sm:$0x1] %v336_v37  ;;  %339 = vst [vmem:[%s309_s16 + $0x12] sm:$0x1] %v338_v38  ;;  %v352_v45 = vld [vmem:[%s730_s3 + $0xd] sm:$0x1] }
  0x38   : > { %343 = vst [vmem:[%s309_s16 + $0x18] sm:$0x1] %v342_v40  ;;  %345 = vst [vmem:[%s309_s16 + $0x1b] sm:$0x1] %v344_v41  ;;  %v354_v46 = vld [vmem:[%s730_s3 + $0xe] sm:$0x1] }
  0x39   : > { %347 = vst [vmem:[%s309_s16 + $0x1e] sm:$0x1] %v346_v42  ;;  %351 = vst [vmem:[%s309_s16 + $0x24] sm:$0x1] %v350_v44 }
  0x3a   : > { %v332_v35 = vld [vmem:[%s730_s3 + $0x3] sm:$0x1]  ;;  %v340_v39 = vld [vmem:[%s730_s3 + $0x7] sm:$0x1]  ;;  %353 = vst [vmem:[%s309_s16 + $0x27] sm:$0x1] %v352_v45 }
  0x3b   : > { %333 = vst [vmem:[%s309_s16 + $0x9] sm:$0x1] %v332_v35  ;;  %341 = vst [vmem:[%s309_s16 + $0x15] sm:$0x1] %v340_v39  ;;  %v348_v43 = vld [vmem:[%s730_s3 + $0xb] sm:$0x1] }
  0x3c   : > { %349 = vst [vmem:[%s309_s16 + $0x21] sm:$0x1] %v348_v43  ;;  %v356_v47 = vld [vmem:[%s730_s3 + $0xf] sm:$0x1]  ;;  %355 = vst [vmem:[%s309_s16 + $0x2a] sm:$0x1] %v354_v46 }
  0x3d   : > { %357 = vst [vmem:[%s309_s16 + $0x2d] sm:$0x1] %v356_v47 }
  0x3e PF: > { %s11_s12 = sadd.s32 1, %s639_s12   ;;  %s815_s6 = smov %s619_s7 }
  0x3f   : > { %p8_p11 = scmp.ge.s32.totalorder %s11_s12, 8   ;;  %s816_s7 = smov %s708_s21 }
  0x40   : > { %s817_s8 = smov %s631_s10  ;;  %s818_s9 = smov %s635_s11 }
  0x41   : > { %s819_s10 = smov %s822_s13  ;;  %s820_s11 = smov %s826_s14 }
  0x42   :  { %10 = sbr.rel (!%p8_p11) target bundleno = 4 (0x4), region = 125 }

</bundles_post_ra>
